<compile_context>
chip_gen: v6e
topology: v6e:2x2x1
jax: 0.10.0
libtpu: 0.0.40
codegen_flags: <defaults>
</compile_context>

<pallas_src>
import functools

import jax
import jax.numpy as jnp
from jax.experimental import pallas as pl
from jax.experimental.pallas import tpu as pltpu


# ------------------------------- tiling utils -------------------------------

def _pick_tile(dim, preferred, granularity):
    """Largest tile <= preferred that divides dim and respects granularity
    (or the full dim, which is always legal)."""
    if dim <= preferred:
        return dim
    t = (preferred // granularity) * granularity
    while t >= granularity:
        if dim % t == 0:
            return t
        t -= granularity
    return dim


# ------------------------------ Pallas kernels ------------------------------

def _gemm_kernel(*refs, has_residual, act):
    """Tiled GEMM: o = act(x @ w + b) [+ residual]; K-accumulating."""
    if has_residual:
        x_ref, w_ref, b_ref, r_ref, o_ref, acc_ref = refs
    else:
        x_ref, w_ref, b_ref, o_ref, acc_ref = refs
        r_ref = None
    k = pl.program_id(2)

    @pl.when(k == 0)
    def _():
        acc_ref[...] = jnp.zeros_like(acc_ref)

    acc_ref[...] += jnp.dot(
        x_ref[...].astype(jnp.bfloat16),
        w_ref[...].astype(jnp.bfloat16),
        preferred_element_type=jnp.float32,
    )

    @pl.when(k == pl.num_programs(2) - 1)
    def _():
        y = acc_ref[...] + b_ref[...].astype(jnp.float32)
        if act == "gelu":
            y = jax.nn.gelu(y, approximate=False)   # timm uses exact erf-GELU
        if r_ref is not None:
            y = y + r_ref[...].astype(jnp.float32)
        o_ref[...] = y.astype(o_ref.dtype)


def _ln_mm_kernel(*refs, n_out, eps, act):
    """Fused LayerNorm + (one or more) matmuls.

    refs = x, ln_g, ln_b, w_0..w_{n-1}, bias_0..bias_{n-1}, o_0..o_{n-1}, nrm.
    The x tile is (TM, D) with the full feature dim so LN statistics are
    exact.  The normalized tile is cached in VMEM scratch at j == 0 and
    reused for all subsequent N-tiles of the same row block.
    """
    x_ref, g_ref, b_ref = refs[0], refs[1], refs[2]
    w_refs = refs[3:3 + n_out]
    bias_refs = refs[3 + n_out:3 + 2 * n_out]
    o_refs = refs[3 + 2 * n_out:3 + 3 * n_out]
    nrm_ref = refs[3 + 3 * n_out]          # VMEM scratch (TM, D) bf16

    @pl.when(pl.program_id(1) == 0)
    def _():
        x = x_ref[...].astype(jnp.float32)
        mean = jnp.mean(x, axis=-1, keepdims=True)
        xc = x - mean
        var = jnp.mean(xc * xc, axis=-1, keepdims=True)
        n = xc * jax.lax.rsqrt(var + eps) * g_ref[...] + b_ref[...]
        nrm_ref[...] = n.astype(nrm_ref.dtype)

    nb = nrm_ref[...]
    for w_ref, bias_ref, o_ref in zip(w_refs, bias_refs, o_refs):
        y = jnp.dot(nb, w_ref[...].astype(jnp.bfloat16),
                    preferred_element_type=jnp.float32)
        y = y + bias_ref[...].astype(jnp.float32)
        if act == "gelu":
            y = jax.nn.gelu(y, approximate=False)
        o_ref[...] = y.astype(o_ref.dtype)


def _ln_kernel(x_ref, g_ref, b_ref, o_ref, *, eps):
    x = x_ref[...].astype(jnp.float32)
    mean = jnp.mean(x, axis=-1, keepdims=True)
    xc = x - mean
    var = jnp.mean(xc * xc, axis=-1, keepdims=True)
    o_ref[...] = (xc * jax.lax.rsqrt(var + eps) * g_ref[...]
                  + b_ref[...]).astype(o_ref.dtype)


def _attn_kernel(q_ref, k_ref, v_ref, o_ref, *, heads, hd, scale, s_valid):
    """One batch element per grid step.  Q/K/V tiles are (1, S_pad, D) with the
    full embed dim on the lane axis (lane-dense loads/stores); heads are split
    inside the kernel.  Padded key positions (>= s_valid) are masked."""
    q = q_ref[0]                      # (S, D) f32, no extra copy
    k = k_ref[0]
    v = v_ref[0]
    s_len = q.shape[0]

    col = jax.lax.broadcasted_iota(jnp.int32, (s_len, s_len), 1)
    valid = col < s_valid

    outs = []
    for h in range(heads):
        sl = slice(h * hd, (h + 1) * hd)
        qh = q[:, sl].astype(jnp.bfloat16)
        kh = k[:, sl].astype(jnp.bfloat16)
        vh = v[:, sl].astype(jnp.bfloat16)
        # q @ k^T without materializing a transpose.
        scores = jax.lax.dot_general(
            qh, kh, (((1,), (1,)), ((), ())),
            preferred_element_type=jnp.float32) * scale
        scores = jnp.where(valid, scores, -1e30)
        p = jnp.exp(scores - jnp.max(scores, axis=-1, keepdims=True))
        denom = jnp.sum(p, axis=-1, keepdims=True)
        p = p * pl.reciprocal(denom, approx=True)   # EUP slot, frees VALU
        outs.append(jnp.dot(p.astype(jnp.bfloat16), vh,
                            preferred_element_type=jnp.float32))
    # Concatenate so the final store is a single lane-dense write of width D.
    o_ref[0] = jnp.concatenate(outs, axis=-1).astype(o_ref.dtype)


# ------------------------------ thin wrappers --------------------------------

def gemm(x, w, b, residual=None, act=None, tm=256, tn=256, tk=512):
    M, K = x.shape
    N = w.shape[1]
    TM = _pick_tile(M, tm, 8)
    TN = _pick_tile(N, tn, 128)
    TK = _pick_tile(K, tk, 128)
    grid = (M // TM, N // TN, K // TK)

    in_specs = [
        pl.BlockSpec((TM, TK), lambda i, j, k: (i, k)),
        pl.BlockSpec((TK, TN), lambda i, j, k: (k, j)),
        pl.BlockSpec((1, TN), lambda i, j, k: (0, j)),
    ]
    operands = [x, w, b.reshape(1, N)]
    if residual is not None:
        in_specs.append(pl.BlockSpec((TM, TN), lambda i, j, k: (i, j)))
        operands.append(residual)

    flops = 2 * M * N * K
    bytes_accessed = 4 * (M * K + K * N + M * N
                          + (M * N if residual is not None else 0))
    return pl.pallas_call(
        functools.partial(_gemm_kernel,
                          has_residual=residual is not None, act=act),
        out_shape=jax.ShapeDtypeStruct((M, N), x.dtype),
        grid=grid,
        in_specs=in_specs,
        out_specs=pl.BlockSpec((TM, TN), lambda i, j, k: (i, j)),
        scratch_shapes=[pltpu.VMEM((TM, TN), jnp.float32)],
        compiler_params=pltpu.CompilerParams(
            dimension_semantics=("parallel", "parallel", "arbitrary")),
        cost_estimate=pl.CostEstimate(flops=flops, transcendentals=0,
                                      bytes_accessed=bytes_accessed),
    )(*operands)


def ln_matmul(x, ln_g, ln_b, ws, bs, act=None, tm=256, tn=256, eps=1e-6):
    """Fused LayerNorm + matmul(s).  LN result cached in VMEM across N-tiles."""
    M, D = x.shape
    N = ws[0].shape[1]
    n_out = len(ws)
    TM = _pick_tile(M, tm, 8)
    TN = _pick_tile(N, tn, 128)
    grid = (M // TM, N // TN)

    x_spec = pl.BlockSpec((TM, D), lambda i, j: (i, 0))
    vec_d = pl.BlockSpec((1, D), lambda i, j: (0, 0))
    w_spec = pl.BlockSpec((D, TN), lambda i, j: (0, j))
    bias_spec = pl.BlockSpec((1, TN), lambda i, j: (0, j))
    o_spec = pl.BlockSpec((TM, TN), lambda i, j: (i, j))

    if n_out == 1:
        out_shape = jax.ShapeDtypeStruct((M, N), x.dtype)
        out_specs = o_spec
    else:
        out_shape = tuple(jax.ShapeDtypeStruct((M, N), x.dtype)
                          for _ in range(n_out))
        out_specs = tuple(o_spec for _ in range(n_out))

    operands = ([x, ln_g.reshape(1, D), ln_b.reshape(1, D)]
                + list(ws) + [b.reshape(1, N) for b in bs])
    flops = 2 * M * N * D * n_out
    bytes_accessed = 4 * (M * D + n_out * (D * N + M * N))
    return pl.pallas_call(
        functools.partial(_ln_mm_kernel, n_out=n_out, eps=eps, act=act),
        out_shape=out_shape,
        grid=grid,
        in_specs=[x_spec, vec_d, vec_d] + [w_spec] * n_out + [bias_spec] * n_out,
        out_specs=out_specs,
        scratch_shapes=[pltpu.VMEM((TM, D), jnp.bfloat16)],
        compiler_params=pltpu.CompilerParams(
            dimension_semantics=("parallel", "arbitrary")),
        cost_estimate=pl.CostEstimate(flops=flops, transcendentals=0,
                                      bytes_accessed=bytes_accessed),
    )(*operands)


def layernorm(x, g, b, eps=1e-6, tm=512):
    M, D = x.shape
    TM = _pick_tile(M, tm, 8)
    return pl.pallas_call(
        functools.partial(_ln_kernel, eps=eps),
        out_shape=jax.ShapeDtypeStruct((M, D), x.dtype),
        grid=(M // TM,),
        in_specs=[pl.BlockSpec((TM, D), lambda i: (i, 0)),
                  pl.BlockSpec((1, D), lambda i: (0, 0)),
                  pl.BlockSpec((1, D), lambda i: (0, 0))],
        out_specs=pl.BlockSpec((TM, D), lambda i: (i, 0)),
        compiler_params=pltpu.CompilerParams(
            dimension_semantics=("parallel",)),
    )(x, g.reshape(1, D), b.reshape(1, D))


def attention(q, k, v, scale, heads, s_valid):
    B, S_pad, D = q.shape
    spec = pl.BlockSpec((1, S_pad, D), lambda b: (b, 0, 0))
    flops = 2 * B * S_pad * S_pad * D * 2
    bytes_accessed = 4 * 4 * B * S_pad * D
    return pl.pallas_call(
        functools.partial(_attn_kernel, heads=heads, hd=D // heads,
                          scale=scale, s_valid=s_valid),
        out_shape=jax.ShapeDtypeStruct((B, S_pad, D), q.dtype),
        grid=(B,),
        in_specs=[spec, spec, spec],
        out_specs=spec,
        compiler_params=pltpu.CompilerParams(
            dimension_semantics=("parallel",)),
        cost_estimate=pl.CostEstimate(flops=flops,
                                      transcendentals=B * S_pad * S_pad * heads,
                                      bytes_accessed=bytes_accessed),
    )(q, k, v)


# --------------------------- ViT forward_features ----------------------------

def vit_forward_features(x, params, cfg):
    """x: (B, C, H, W) float32 -> (B, 1 + num_patches, D) float32."""
    B, C, H, W = x.shape
    p, D, heads = cfg["patch"], cfg["dim"], cfg["heads"]
    nH, nW = H // p, W // p
    npatch = nH * nW
    hd = D // heads
    scale = hd ** -0.5
    S = npatch + 1
    # pad sequence length to a sublane/lane-friendly size (197 -> 256 at real scale)
    if S > 128:
        S_pad = ((S + 127) // 128) * 128
    else:
        S_pad = ((S + 7) // 8) * 8

    # Conv2d(C, D, kernel=p, stride=p) as a matmul (same weight-flatten order).
    patches = (x.reshape(B, C, nH, p, nW, p)
                 .transpose(0, 2, 4, 1, 3, 5)
                 .reshape(B * npatch, C * p * p))
    tokens = gemm(patches, params["patch_w"], params["patch_b"]).reshape(B, npatch, D)

    cls = jnp.broadcast_to(params["cls_token"], (B, 1, D))
    h = jnp.concatenate([cls, tokens], axis=1) + params["pos_embed"]  # (B, S, D)
    h = jnp.pad(h, ((0, 0), (0, S_pad - S), (0, 0)))                   # (B, S_pad, D)

    M = B * S_pad
    h2 = h.reshape(M, D)
    for blk in params["blocks"]:
        # pre-LN + QKV projection fused; q/k/v come out in (B*S_pad, D) layout,
        # so no 5-D transposes are ever materialized.
        q, k, v = ln_matmul(h2, blk["ln1_g"], blk["ln1_b"],
                            [blk["q_w"], blk["k_w"], blk["v_w"]],
                            [blk["q_b"], blk["k_b"], blk["v_b"]])
        a = attention(q.reshape(B, S_pad, D), k.reshape(B, S_pad, D),
                      v.reshape(B, S_pad, D), scale, heads, S)
        h2 = gemm(a.reshape(M, D), blk["proj_w"], blk["proj_b"], residual=h2)
        # pre-LN + FC1 + GELU fused; FC2 + residual as a K-accumulating GEMM.
        m = ln_matmul(h2, blk["ln2_g"], blk["ln2_b"],
                      [blk["fc1_w"]], [blk["fc1_b"]], act="gelu")
        h2 = gemm(m, blk["fc2_w"], blk["fc2_b"], residual=h2)

    out = layernorm(h2, params["norm_g"], params["norm_b"])
    return out.reshape(B, S_pad, D)[:, :S, :]


# --------------------------- deterministic params ----------------------------

def init_params(key, cfg):
    C, p, D, heads, mlp, depth = (
        cfg["in_chans"], cfg["patch"], cfg["dim"], cfg["heads"],
        cfg["mlp"], cfg["depth"],
    )
    npatch = cfg["num_patches"]
    keys = iter(jax.random.split(key, 8 + depth * 12))

    def w(shape, scale=0.02):
        return (scale * jax.random.normal(next(keys), shape)).astype(jnp.float32)

    params = {
        "patch_w": w((C * p * p, D)),
        "patch_b": jnp.zeros((D,), jnp.float32),
        "cls_token": w((1, 1, D)),
        "pos_embed": w((1, npatch + 1, D)),
        "norm_g": jnp.ones((D,), jnp.float32),
        "norm_b": jnp.zeros((D,), jnp.float32),
        "blocks": [],
    }
    for _ in range(depth):
        params["blocks"].append({
            "ln1_g": jnp.ones((D,), jnp.float32),
            "ln1_b": jnp.zeros((D,), jnp.float32),
            # qkv Linear stored as three (D, D) matrices (same math as the
            # single (D, 3D) timm weight, just pre-split).
            "q_w": w((D, D)), "q_b": jnp.zeros((D,), jnp.float32),
            "k_w": w((D, D)), "k_b": jnp.zeros((D,), jnp.float32),
            "v_w": w((D, D)), "v_b": jnp.zeros((D,), jnp.float32),
            "proj_w": w((D, D)),
            "proj_b": jnp.zeros((D,), jnp.float32),
            "ln2_g": jnp.ones((D,), jnp.float32),
            "ln2_b": jnp.zeros((D,), jnp.float32),
            "fc1_w": w((D, mlp)),
            "fc1_b": jnp.zeros((mlp,), jnp.float32),
            "fc2_w": w((mlp, D)),
            "fc2_b": jnp.zeros((D,), jnp.float32),
        })
    return params


# ------------------------------------ main -----------------------------------

if __name__ == "__main__":
    # Small synthetic ViT config (vit_base_patch16_224 is the same graph at
    # D=768, depth=12, heads=12, 224x224 input; the tiling helpers then pick
    # 256/256/384-512 tiles automatically).
    cfg = {
        "in_chans": 3, "patch": 16, "img": 32,
        "dim": 32, "heads": 4, "mlp": 128, "depth": 2,
    }
    cfg["num_patches"] = (cfg["img"] // cfg["patch"]) ** 2

    key = jax.random.PRNGKey(0)
    kx, kp = jax.random.split(key)
    B = 2
    x = jax.random.normal(kx, (B, cfg["in_chans"], cfg["img"], cfg["img"]),
                          jnp.float32)
    params = init_params(kp, cfg)

    feats = vit_forward_features(x, params, cfg)
    feats = jax.block_until_ready(feats)

    expected = (B, cfg["num_patches"] + 1, cfg["dim"])
    assert feats.shape == expected, (feats.shape, expected)
    assert feats.dtype == jnp.float32
    assert bool(jnp.all(jnp.isfinite(feats)))
    # forward() would unsqueeze only if features were 2-D; ViT returns 3-D tokens.
    print("KERNEL_OK")
</pallas_src>

<mosaic_0001>
module attributes {stable_mosaic.version = 11 : i64} {
  func.func @_gemm_kernel(%arg0: i32, %arg1: i32, %arg2: i32, %arg3: memref<8x384xf32, #tpu.memory_space<vmem>>, %arg4: memref<384x32xf32, #tpu.memory_space<vmem>>, %arg5: memref<1x32xf32, #tpu.memory_space<vmem>>, %arg6: memref<8x32xf32, #tpu.memory_space<vmem>>, %arg7: memref<8x32xf32, #tpu.memory_space<vmem>>) attributes {dimension_semantics = [#tpu.dimension_semantics<parallel>, #tpu.dimension_semantics<parallel>, #tpu.dimension_semantics<arbitrary>], iteration_bounds = array<i64: 1, 1, 2>, scalar_prefetch = 0 : i64, scratch_operands = 1 : i64, tpu.core_type = #tpu.core_type<tc>, window_params = [{transform_indices = @transform_0, window_bounds = array<i64: 8, 384>}, {transform_indices = @transform_1, window_bounds = array<i64: 384, 32>}, {transform_indices = @transform_2, window_bounds = array<i64: 1, 32>}, {transform_indices = @transform_3, window_bounds = array<i64: 8, 32>}]} {
    %c0_i32 = arith.constant 0 : i32
    %0 = arith.cmpi eq, %arg2, %c0_i32 : i32
    %1 = arith.extui %0 : i1 to i32
    %c0_i32_0 = arith.constant 0 : i32
    %2 = arith.cmpi ne, %1, %c0_i32_0 : i32
    scf.if %2 {
      %cst_9 = arith.constant 0.000000e+00 : f32
      %14 = vector.broadcast %cst_9 : f32 to vector<8x32xf32>
      %c0_10 = arith.constant 0 : index
      %c0_11 = arith.constant 0 : index
      %15 = vector.load %arg7[%c0_10, %c0_11] : memref<8x32xf32, #tpu.memory_space<vmem>>, vector<8x32xf32>
      tpu.vector_store %arg7[%c0_10, %c0_11], %14 {strides = array<i32>} : memref<8x32xf32, #tpu.memory_space<vmem>>, vector<8x32xf32>,
    } else {
    }
    %c0 = arith.constant 0 : index
    %c0_1 = arith.constant 0 : index
    %3 = vector.load %arg7[%c0, %c0_1] : memref<8x32xf32, #tpu.memory_space<vmem>>, vector<8x32xf32>
    %c0_2 = arith.constant 0 : index
    %c0_3 = arith.constant 0 : index
    %4 = vector.load %arg3[%c0_2, %c0_3] : memref<8x384xf32, #tpu.memory_space<vmem>>, vector<8x384xf32>
    %5 = arith.truncf %4 : vector<8x384xf32> to vector<8x384xbf16>
    %c0_4 = arith.constant 0 : index
    %c0_5 = arith.constant 0 : index
    %6 = vector.load %arg4[%c0_4, %c0_5] : memref<384x32xf32, #tpu.memory_space<vmem>>, vector<384x32xf32>
    %7 = arith.truncf %6 : vector<384x32xf32> to vector<384x32xbf16>
    %cst = arith.constant dense<0.000000e+00> : vector<8x32xf32>
    %8 = tpu.matmul %5, %7, %cst {dimension_numbers = #tpu.dot_dimension_numbers<[1], [0], [0], [1], [0, 0, 1, 1], [], []>} : vector<8x384xbf16>, vector<384x32xbf16>, vector<8x32xf32> -> vector<8x32xf32>
    %9 = arith.addf %3, %8 : vector<8x32xf32>
    %c0_6 = arith.constant 0 : index
    %c0_7 = arith.constant 0 : index
    %10 = vector.load %arg7[%c0_6, %c0_7] : memref<8x32xf32, #tpu.memory_space<vmem>>, vector<8x32xf32>
    tpu.vector_store %arg7[%c0_6, %c0_7], %9 {strides = array<i32>} : memref<8x32xf32, #tpu.memory_space<vmem>>, vector<8x32xf32>,
    %c1_i32 = arith.constant 1 : i32
    %11 = arith.cmpi eq, %arg2, %c1_i32 : i32
    %12 = arith.extui %11 : i1 to i32
    %c0_i32_8 = arith.constant 0 : i32
    %13 = arith.cmpi ne, %12, %c0_i32_8 : i32
    scf.if %13 {
      %c0_9 = arith.constant 0 : index
      %c0_10 = arith.constant 0 : index
      %14 = vector.load %arg7[%c0_9, %c0_10] : memref<8x32xf32, #tpu.memory_space<vmem>>, vector<8x32xf32>
      %c0_11 = arith.constant 0 : index
      %c0_12 = arith.constant 0 : index
      %15 = vector.load %arg5[%c0_11, %c0_12] : memref<1x32xf32, #tpu.memory_space<vmem>>, vector<1x32xf32>
      %16 = vector.broadcast %15 : vector<1x32xf32> to vector<8x32xf32>
      %17 = arith.addf %14, %16 : vector<8x32xf32>
      %c0_13 = arith.constant 0 : index
      %c0_14 = arith.constant 0 : index
      %18 = vector.load %arg6[%c0_13, %c0_14] : memref<8x32xf32, #tpu.memory_space<vmem>>, vector<8x32xf32>
      tpu.vector_store %arg6[%c0_13, %c0_14], %17 {strides = array<i32>} : memref<8x32xf32, #tpu.memory_space<vmem>>, vector<8x32xf32>,
    } else {
    }
    return
  }
  func.func @transform_0(%arg0: i32, %arg1: i32, %arg2: i32) -> (i32, i32) {
    %c0_i32 = arith.constant 0 : i32
    return %arg0, %arg2 : i32, i32
  }
  func.func @transform_1(%arg0: i32, %arg1: i32, %arg2: i32) -> (i32, i32) {
    %c0_i32 = arith.constant 0 : i32
    return %arg2, %arg1 : i32, i32
  }
  func.func @transform_2(%arg0: i32, %arg1: i32, %arg2: i32) -> (i32, i32) {
    %c0_i32 = arith.constant 0 : i32
    %c0_i32_0 = arith.constant 0 : i32
    return %c0_i32, %arg1 : i32, i32
  }
  func.func @transform_3(%arg0: i32, %arg1: i32, %arg2: i32) -> (i32, i32) {
    %c0_i32 = arith.constant 0 : i32
    return %arg0, %arg1 : i32, i32
  }
}

</mosaic_0001>

<bundles_post_ra>
// kernel: tpu_custom_call.1
= control target key start
LH: loop header
LB: loop body
LE: loop exit
PB: predicated region body
PF: predicated region fallthrough
CT: control target
= control target key end

     0   :  { %8 = vsyncpa [#allocation4], 0  ;;  %s701_s12 = smov 0   ;;  %s703_s13 = smov 0   ;;  %s825_s0 = inlined_call_operand.vmem [shape: f32[8,768], index: 0, kind: input, shape index: {}]   ;;  %s826_s1 = inlined_call_operand.vmem [shape: f32[768,32], index: 1, kind: input, shape index: {}]   ;;  %s827_s2 = inlined_call_operand.vmem [shape: f32[1,32], index: 2, kind: input, shape index: {}]   ;;  %s828_s3 = inlined_call_operand.hbm [shape: f32[8,32], index: 3, kind: output, shape index: {}]  }
   0x1   :  { %s705_s14 = smov 0  }
   0x2 LB: > { %s526_s15 = sadd.s32 4294967295, %s675_s14   ;;  %s26_s16 = sadd.s32 1, %s671_s13  ;;  %s675_s14 = sphi %s705_s14, %s14_s14   ;;  %s671_s13 = sphi %s703_s13, %s831_s13   ;;  %s667_s12 = sphi %s701_s12, %s830_s12  }
   0x3   : > { %p27_p0 = scmp.ge.s32.totalorder %s26_s16, 2  ;;  %p530_p1 = scmp.ge.s32.totalorder %s675_s14, 1 }
   0x4   : > { %p190_p2 = scmp.lt.s32.totalorder %s675_s14, 3 }
   0x5   : > { %s833_s16 = smov (%p27_p0, %s26_s16), 0 }
   0x6   : > { %p191_p3 = pnand %p530_p1, %p190_p2 }
   0x7   : > { %s224_s17 = smul.u32 (!%p191_p3), 3, %s667_s12  ;;  %p533_p6 = scmp.ne.s32.totalorder (!%p191_p3), %s667_s12, 0 }
   0x8   : > { %194 = sbr.rel (%p191_p3) target bundleno = 286 (0x11e), region = 32 }
   0x9   : > { %s234_s18 = smul.u32 (!%p191_p3), 48, %s667_s12  ;;  %p227_p4 = scmp.lt.s32.totalorder (!%p191_p3), %s224_s17, 5 }
   0xb   : > { %p235_p5 = scmp.lt.s32.totalorder (!%p191_p3), %s234_s18, 95 }
   0xd   : > { %s835_s17 = smov (!%p227_p4, %s224_s17), 5  ;;  %s837_s18 = smov (!%p235_p5, %s234_s18), 95 }
   0xe   : > { %s531_s19 = sshll.u32 %s835_s17, 3  ;;  %s532_s23 = sshll.u32 %s837_s18, 3 }
   0xf   : > { %s727_s22 = scalar_lea.vmem %s825_s0, %s531_s19  ;;  %s732_s26 = scalar_lea.vmem %s826_s1, %s532_s23 }
  0x10   : > { %250 = sbr.rel (%p533_p6) target bundleno = 23 (0x17), region = 36 }
  0x15   : > { %vm251_vm0 = vcmask 261120   ;;  %v677_v0 = vmov 0.0  }
  0x16   : > { %252 = vst.msk [vmem:[#allocation2] sm:$0xff] %vm251_vm0, %v677_v0 }
  0x17 PF: > { %v290_v1 = vld [vmem:[%s732_s26 + $0xf0] sm:$0xff]  ;;  %v291_v2 = vld [vmem:[%s732_s26 + $0xf8] sm:$0xff]  ;;  %v678_v4 = vmov 0.0   ;;  %vm679_vm1 = vmmov 0   ;;  %v288_v11 = vld [vmem:[%s732_s26 + $0xe0] sm:$0xff]  ;;  %vm413_vm2 = vcmask 261120  }
  0x18   : > { %v306_v3 = vld [vmem:[%s732_s26 + $0x170] sm:$0xff]  ;;  %571 = vmatprep.subr.bf16.mxu1 %v678_v4  ;;  %v323_v5 = vpack.c.bf16 %v291_v2, %v290_v1  ;;  %v307_v6 = vld [vmem:[%s732_s26 + $0x178] sm:$0xff]  ;;  %587 = vmatprep.mubr.msk.bf16.mxu1 %vm679_vm1, %v678_v4  ;;  %v289_v12 = vld [vmem:[%s732_s26 + $0xe8] sm:$0xff]  ;;  %p534_p7 = scmp.ne.s32.totalorder %s667_s12, 1 }
  0x19   : > { %v274_v7 = vld [vmem:[%s732_s26 + $0x70] sm:$0xff]  ;;  %v275_v8 = vld [vmem:[%s732_s26 + $0x78] sm:$0xff]  ;;  %v331_v9 = vpack.c.bf16 %v307_v6, %v306_v3  ;;  %v304_v13 = vld [vmem:[%s732_s26 + $0x160] sm:$0xff]  ;;  %v322_v14 = vpack.c.bf16 %v289_v12, %v288_v11 }
  0x1a   : > { %v315_v10 = vpack.c.bf16 %v275_v8, %v274_v7  ;;  %540 = vmatprep.subr.bf16.mxu0 %v323_v5  ;;  %v305_v15 = vld [vmem:[%s732_s26 + $0x168] sm:$0xff]  ;;  %v272_v16 = vld [vmem:[%s732_s26 + $0x60] sm:$0xff]  ;;  %v286_v20 = vld [vmem:[%s732_s26 + $0xd0] sm:$0xff] }
  0x1b   : > { %v273_v17 = vld [vmem:[%s732_s26 + $0x68] sm:$0xff]  ;;  %572 = vmatpush3.bf16.msra.mxu1 %v331_v9  ;;  %v330_v18 = vpack.c.bf16 %v305_v15, %v304_v13  ;;  %v287_v21 = vld [vmem:[%s732_s26 + $0xd8] sm:$0xff]  ;;  %v302_v22 = vld [vmem:[%s732_s26 + $0x150] sm:$0xff] }
  0x1c   : > { %541 = vmatpush3.bf16.msra.mxu0 %v315_v10  ;;  %v314_v19 = vpack.c.bf16 %v273_v17, %v272_v16  ;;  %573 = vmatprep.subr.bf16.mxu1 %v678_v4  ;;  %v321_v23 = vpack.c.bf16 %v287_v21, %v286_v20  ;;  %v303_v24 = vld [vmem:[%s732_s26 + $0x158] sm:$0xff]  ;;  %v270_v25 = vld [vmem:[%s732_s26 + $0x50] sm:$0xff]  ;;  %v284_v27 = vld [vmem:[%s732_s26 + $0xc0] sm:$0xff] }
  0x1d   : > { %542 = vmatprep.subr.bf16.mxu0 %v322_v14  ;;  %v271_v26 = vld [vmem:[%s732_s26 + $0x58] sm:$0xff]  ;;  %v285_v28 = vld [vmem:[%s732_s26 + $0xc8] sm:$0xff]  ;;  %v329_v29 = vpack.c.bf16 %v303_v24, %v302_v22  ;;  %v300_v31 = vld [vmem:[%s732_s26 + $0x140] sm:$0xff] }
  0x1e   : > { %v313_v30 = vpack.c.bf16 %v271_v26, %v270_v25  ;;  %v320_v32 = vpack.c.bf16 %v285_v28, %v284_v27  ;;  %v301_v33 = vld [vmem:[%s732_s26 + $0x148] sm:$0xff]  ;;  %v268_v34 = vld [vmem:[%s732_s26 + $0x40] sm:$0xff]  ;;  %v282_v36 = vld [vmem:[%s732_s26 + $0xb0] sm:$0xff] }
  0x1f   : > { %574 = vmatpush3.bf16.msra.mxu1 %v330_v18  ;;  %v269_v35 = vld [vmem:[%s732_s26 + $0x48] sm:$0xff]  ;;  %v283_v37 = vld [vmem:[%s732_s26 + $0xb8] sm:$0xff]  ;;  %v328_v38 = vpack.c.bf16 %v301_v33, %v300_v31  ;;  %v298_v40 = vld [vmem:[%s732_s26 + $0x130] sm:$0xff] }
  0x20   : > { %543 = vmatpush3.bf16.msra.mxu0 %v314_v19  ;;  %575 = vmatprep.subr.bf16.mxu1 %v678_v4  ;;  %v312_v39 = vpack.c.bf16 %v269_v35, %v268_v34  ;;  %v319_v41 = vpack.c.bf16 %v283_v37, %v282_v36  ;;  %v299_v42 = vld [vmem:[%s732_s26 + $0x138] sm:$0xff]  ;;  %v266_v43 = vld [vmem:[%s732_s26 + $0x30] sm:$0xff]  ;;  %v280_v45 = vld [vmem:[%s732_s26 + $0xa0] sm:$0xff] }
  0x21   : > { %544 = vmatprep.subr.bf16.mxu0 %v321_v23  ;;  %v267_v44 = vld [vmem:[%s732_s26 + $0x38] sm:$0xff]  ;;  %v281_v46 = vld [vmem:[%s732_s26 + $0xa8] sm:$0xff]  ;;  %v327_v47 = vpack.c.bf16 %v299_v42, %v298_v40  ;;  %v296_v49 = vld [vmem:[%s732_s26 + $0x120] sm:$0xff] }
  0x22   : > { %v311_v48 = vpack.c.bf16 %v267_v44, %v266_v43  ;;  %v255_v50 = vld [vmem:[%s727_s22 + $0x8] sm:$0xff]  ;;  %v318_v51 = vpack.c.bf16 %v281_v46, %v280_v45  ;;  %v264_v53 = vld [vmem:[%s732_s26 + $0x20] sm:$0xff]  ;;  %v278_v56 = vld [vmem:[%s732_s26 + $0x90] sm:$0xff] }
  0x23   : > { %576 = vmatpush3.bf16.msra.mxu1 %v329_v29  ;;  %v297_v52 = vld [vmem:[%s732_s26 + $0x128] sm:$0xff]  ;;  %v258_v55 = vpack.c.bf16 %v255_v50, %v255_v50  ;;  %v279_v57 = vld [vmem:[%s732_s26 + $0x98] sm:$0xff]  ;;  %v294_v60 = vld [vmem:[%s732_s26 + $0x110] sm:$0xff] }
  0x24   : > { %545 = vmatpush3.bf16.msra.mxu0 %v313_v30  ;;  %577 = vmatprep.subr.bf16.mxu1 %v678_v4  ;;  %v265_v54 = vld [vmem:[%s732_s26 + $0x28] sm:$0xff]  ;;  %v326_v58 = vpack.c.bf16 %v297_v52, %v296_v49  ;;  %v317_v61 = vpack.c.bf16 %v279_v57, %v278_v56  ;;  %v295_v62 = vld [vmem:[%s732_s26 + $0x118] sm:$0xff]  ;;  %v262_v63 = vld [vmem:[%s732_s26 + $0x10] sm:$0xff] }
  0x25   : > { %546 = vmatprep.subr.bf16.mxu0 %v320_v32  ;;  %364 = vmatprep.mubr.bf16.mxu0 %v258_v55  ;;  %v310_v59 = vpack.c.bf16 %v265_v54, %v264_v53  ;;  %v263_v0 = vld [vmem:[%s732_s26 + $0x18] sm:$0xff]  ;;  %v276_v1 = vld [vmem:[%s732_s26 + $0x80] sm:$0xff]  ;;  %v277_v2 = vld [vmem:[%s732_s26 + $0x88] sm:$0xff]  ;;  %v325_v3 = vpack.c.bf16 %v295_v62, %v294_v60 }
  0x26   : > { %v309_v5 = vpack.c.bf16 %v263_v0, %v262_v63  ;;  %v292_v6 = vld [vmem:[%s732_s26 + $0x100] sm:$0xff]  ;;  %v316_v7 = vpack.c.bf16 %v277_v2, %v276_v1  ;;  %v293_v8 = vld [vmem:[%s732_s26 + $0x108] sm:$0xff]  ;;  %v256_v13 = vld [vmem:[%s727_s22 + $0x10] sm:$0xff] }
  0x27   : > { %578 = vmatpush3.bf16.msra.mxu1 %v328_v38  ;;  %v260_v9 = vld [vmem:[%s732_s26] sm:$0xff]  ;;  %v261_v10 = vld [vmem:[%s732_s26 + $0x8] sm:$0xff]  ;;  %v324_v11 = vpack.c.bf16 %v293_v8, %v292_v6  ;;  %v259_v15 = vpack.c.bf16 %v256_v13, %v256_v13 }
  0x28   : > { %547 = vmatpush3.bf16.msra.mxu0 %v312_v39  ;;  %579 = vmatprep.subr.bf16.mxu1 %v678_v4  ;;  %v308_v12 = vpack.c.bf16 %v261_v10, %v260_v9  ;;  %v254_v14 = vld [vmem:[%s727_s22] sm:$0xff] }
  0x29   : > { %548 = vmatprep.subr.bf16.mxu0 %v319_v41  ;;  %v257_v16 = vpack.c.bf16 %v254_v14, %v254_v14  ;;  %v253_v22 = vld [vmem:[#allocation2] sm:$0xff] }
  0x2b   : > { %580 = vmatpush3.bf16.msra.mxu1 %v327_v47 }
  0x2c   : > { %549 = vmatpush3.bf16.msra.mxu0 %v311_v48  ;;  %581 = vmatprep.subr.bf16.mxu1 %v678_v4 }
  0x2d   : > { %550 = vmatprep.subr.bf16.mxu0 %v318_v51 }
  0x2f   : > { %582 = vmatpush3.bf16.msra.mxu1 %v326_v58 }
  0x30   : > { %551 = vmatpush3.bf16.msra.mxu0 %v310_v59  ;;  %583 = vmatprep.subr.bf16.mxu1 %v678_v4 }
  0x31   : > { %552 = vmatprep.subr.bf16.mxu0 %v317_v61 }
  0x33   : > { %584 = vmatpush3.bf16.msra.mxu1 %v325_v3 }
  0x34   : > { %553 = vmatpush3.bf16.msra.mxu0 %v309_v5  ;;  %585 = vmatprep.subr.bf16.mxu1 %v678_v4 }
  0x35   : > { %554 = vmatprep.subr.bf16.mxu0 %v316_v7 }
  0x37   : > { %586 = vmatpush3.bf16.msra.mxu1 %v324_v11 }
  0x38   : > { %555 = vmatpush3.bf16.msra.mxu0 %v308_v12 }
  0x3a   : > { %588 = vmatmul.mubr.bf16.vlgmr.msra.gmra.mxu1 %v259_v15 }
  0x3b   : > { %365 = vmatmul.mubr.bf16.vlgmr.msra.gmra.mxu0 %v257_v16 }
  0xfa   : > { %v406_v17 = vpop.f32.mrf.mxu1 }
  0xfb   : > { %v556_v18 = vpop.f32.mrf.mxu0 }
  0xfc   : > { %v589_v19 = vpop.f32.mrf.mxu1 }
  0xfd   : > { %v557_v20 = vpop.f32.mrf.mxu0 }
  0xfe   : > { %v558_v21 = vadd.f32 %v557_v20, %v556_v18  ;;  %v409_v23 = vpop.f32.mrf.mxu1 }
  0xff   : > { %v559_v24 = vpop.f32.mrf.mxu0 }
 0x100   : > { %v407_v25 = vadd.f32 %v558_v21, %v406_v17  ;;  %v590_v26 = vpop.f32.mrf.mxu1  ;;  %418 = sbr.rel (%p534_p7) target bundleno = 271 (0x10f), region = 40 }
 0x101   : > { %v560_v27 = vpop.f32.mrf.mxu0 }
 0x102   : > { %v412_v4 = vadd.f32 %v407_v25, %v253_v22 }
 0x104   : > { %414 = vst.msk [vmem:[#allocation2] sm:$0xff] %vm413_vm2, %v412_v4 }
 0x105   : > { %v535_v29 = vld [vmem:[%s827_s2] ss:$0 sm:$0xff] }
 0x10b   : > { %v419_v28 = vld [vmem:[#allocation2] sm:$0xff] }
 0x10c   : > { %v427_v30 = vadd.f32 %v535_v29, %v419_v28 }
 0x10e   : > { %428 = vst.msk [vmem:[#allocation3] sm:$0xff] %vm413_vm2, %v427_v30 }
 0x10f PF: > { %p801_p8 = scmp.eq.s32.totalorder %s526_s15, 1  ;;  %s680_s30 = smov [#allocation3]  }
 0x110   : > { %s439_s4 = sshll.u32 %s680_s30, 4  ;;  %s440_s4 = int_to_ptr.vmem [resolvable:$true] %s439_s4 }
 0x111   : > { %s625_s5 = scalar_lea.vmem %s440_s4, 128  ;;  %p632_p12 = scmp.lt.s32.totalorder %s440_s4, %s440_s4 }
 0x112   : > { %p626_p9 = scmp.ne.s32.totalorder %s440_s4, %s625_s5  ;;  %p633_p13 = scmp.lt.s32.totalorder %s625_s5, %s625_s5 }
 0x114   : > { %p627_p10 = pnand %p626_p9, %p801_p8  ;;  %p634_p0 = por %p633_p13, %p632_p12 }
 0x116   : > { %p628_p11 = pneg %p627_p10 }
 0x118   : > { %p635_p1 = pnand %p634_p0, %p628_p11 }
 0x11a   : > { %638 = shalt.err (!%p635_p1)
}
 0x11b   : > { %592 = dma.vmem_to_hbm [thread:$0]  (%p801_p8), %s440_s4, 128, %s828_s3, [#allocation4]  }
 0x11c   : > { %662 = dma.done.wait (%p801_p8), [#allocation4], 128  }
 0x11d   : > { %664 = vsyncadd (%p801_p8), [#allocation4], 4294967168 }
 0x11e PF: > { %s14_s14 = sadd.s32 1, %s675_s14   ;;  %s830_s12 = smov %s671_s13 }
 0x11f   : > { %p11_p2 = scmp.ge.s32.totalorder %s14_s14, 4   ;;  %s831_s13 = smov %s833_s16 }
 0x121   :  { %13 = sbr.rel (!%p11_p2) target bundleno = 2 (0x2), region = 74 }
 0x126   :  { %452 = vsyncpa [#allocation4], 1 }
 0x127   :  { %454 = vsyncpa [#allocation4 + $0x1], 1 }

</bundles_post_ra>
